<compile_context>
chip_gen: v7x
topology: tpu7x:2x2x1
jax: 0.10.0
libtpu: 0.0.40
codegen_flags: <defaults>
</compile_context>

<pallas_src>
import jax
import jax.numpy as jnp
from jax.experimental import pallas as pl
from jax.experimental.pallas import tpu as pltpu


def conv1x1_bn_relu_kernel(x_ref, w_ref, bias_ref, o_ref):
    # x_ref:    (Cin, P)    input pixels in native channel-major layout
    # w_ref:    (Cout, Cin) conv weight with folded BN scale
    # bias_ref: (Cout, 1)   folded BN bias = beta - mean * scale
    # o_ref:    (Cout, P)
    y = jnp.dot(w_ref[...], x_ref[...], preferred_element_type=jnp.float32)
    o_ref[...] = jnp.maximum(y + bias_ref[...], 0.0).astype(o_ref.dtype)


def conv_bn_relu(x_nchw, weight, gamma, beta, running_mean, running_var, eps=1e-5):
    N, C, H, W = x_nchw.shape
    Cout = weight.shape[0]
    # Module spec is batch 1; for N=1 the NCHW->(C, H*W) reshape is free.
    assert N == 1, "kernel assumes N == 1 (matches the module's (1,96,7,7) input)"
    P = N * H * W

    x_mat = x_nchw.reshape(C, P)  # (Cin, P) — free reshape, no transpose

    # Fold BatchNorm (inference) into the conv weight and a bias.
    # In a real deployment this fold would be done once at parameter-prep time.
    scale = gamma / jnp.sqrt(running_var + eps)                 # (Cout,)
    w_folded = weight.reshape(Cout, C) * scale[:, None]          # (Cout, Cin)
    bias = (beta - running_mean * scale).reshape(Cout, 1)        # (Cout, 1)

    out_mat = pl.pallas_call(
        conv1x1_bn_relu_kernel,
        out_shape=jax.ShapeDtypeStruct((Cout, P), x_nchw.dtype),
        in_specs=[
            pl.BlockSpec(memory_space=pltpu.VMEM),
            pl.BlockSpec(memory_space=pltpu.VMEM),
            pl.BlockSpec(memory_space=pltpu.VMEM),
        ],
        out_specs=pl.BlockSpec(memory_space=pltpu.VMEM),
    )(x_mat, w_folded, bias)

    return out_mat.reshape(N, Cout, H, W)  # free reshape back to NCHW


if __name__ == "__main__":
    key = jax.random.PRNGKey(0)
    k_x, k_w, k_g, k_b, k_m, k_v = jax.random.split(key, 6)

    # Shapes implied by the module: input (1, 96, 7, 7), conv 96->96 1x1.
    N, C, H, W = 1, 96, 7, 7
    Cout = 96

    x = jax.random.normal(k_x, (N, C, H, W), dtype=jnp.float32)
    weight = jax.random.normal(k_w, (Cout, C, 1, 1), dtype=jnp.float32) * 0.1
    gamma = jax.random.normal(k_g, (Cout,), dtype=jnp.float32) * 0.1 + 1.0
    beta = jax.random.normal(k_b, (Cout,), dtype=jnp.float32) * 0.1
    running_mean = jax.random.normal(k_m, (Cout,), dtype=jnp.float32) * 0.1
    running_var = jnp.abs(jax.random.normal(k_v, (Cout,), dtype=jnp.float32)) * 0.1 + 1.0

    out = conv_bn_relu(x, weight, gamma, beta, running_mean, running_var)
    jax.block_until_ready(out)

    # Reference in plain JAX (inference-mode BN folded the "textbook" way:
    # conv, then per-channel affine, then ReLU).
    x_flat = x.reshape(C, H * W)                                   # (Cin, P)
    y = weight.reshape(Cout, C) @ x_flat                           # (Cout, P)
    scale = gamma / jnp.sqrt(running_var + 1e-5)
    y = y * scale[:, None] + (beta - running_mean * scale)[:, None]
    ref = jnp.maximum(y, 0.0).reshape(N, Cout, H, W)

    assert out.shape == (N, Cout, H, W)
    assert jnp.allclose(out, ref, atol=1e-4, rtol=1e-4)

    print("KERNEL_OK")
</pallas_src>

<mosaic_0001>
module attributes {stable_mosaic.version = 11 : i64} {
  func.func @conv1x1_bn_relu_kernel(%arg0: memref<96x49xf32, #tpu.memory_space<vmem>>, %arg1: memref<96x96xf32, #tpu.memory_space<vmem>>, %arg2: memref<96x1xf32, #tpu.memory_space<vmem>>, %arg3: memref<96x49xf32, #tpu.memory_space<vmem>>) attributes {dimension_semantics = [], scalar_prefetch = 0 : i64, scratch_operands = 0 : i64, tpu.core_type = #tpu.core_type<tc>} {
    %c0 = arith.constant 0 : index
    %c0_0 = arith.constant 0 : index
    %0 = vector.load %arg1[%c0, %c0_0] : memref<96x96xf32, #tpu.memory_space<vmem>>, vector<96x96xf32>
    %c0_1 = arith.constant 0 : index
    %c0_2 = arith.constant 0 : index
    %1 = vector.load %arg0[%c0_1, %c0_2] : memref<96x49xf32, #tpu.memory_space<vmem>>, vector<96x49xf32>
    %cst = arith.constant dense<0.000000e+00> : vector<96x49xf32>
    %2 = tpu.matmul %0, %1, %cst {dimension_numbers = #tpu.dot_dimension_numbers<[1], [0], [0], [1], [0, 0, 1, 1], [], []>} : vector<96x96xf32>, vector<96x49xf32>, vector<96x49xf32> -> vector<96x49xf32>
    %c0_3 = arith.constant 0 : index
    %c0_4 = arith.constant 0 : index
    %3 = vector.load %arg2[%c0_3, %c0_4] : memref<96x1xf32, #tpu.memory_space<vmem>>, vector<96x1xf32>
    %4 = vector.broadcast %3 : vector<96x1xf32> to vector<96x49xf32>
    %5 = arith.addf %2, %4 : vector<96x49xf32>
    %cst_5 = arith.constant 0.000000e+00 : f32
    %6 = vector.broadcast %cst_5 : f32 to vector<96x49xf32>
    %7 = arith.maximumf %5, %6 : vector<96x49xf32>
    %c0_6 = arith.constant 0 : index
    %c0_7 = arith.constant 0 : index
    %8 = vector.load %arg3[%c0_6, %c0_7] : memref<96x49xf32, #tpu.memory_space<vmem>>, vector<96x49xf32>
    tpu.vector_store %arg3[%c0_6, %c0_7], %7 {strides = array<i32>} : memref<96x49xf32, #tpu.memory_space<vmem>>, vector<96x49xf32>,
    return
  }
}

</mosaic_0001>

<bundles_post_ra>
// kernel: tpu_custom_call.1
= control target key start
LH: loop header
LB: loop body
LE: loop exit
PB: predicated region body
PF: predicated region fallthrough
CT: control target
= control target key end

     0   :  { %v418_v3 = vmov 0   ;;  %vm110_vm0 = vcmask 785408   ;;  %vm284_vm1 = vcmask 400384   ;;  %s607_s0 = inlined_call_operand.vmem [shape: f32[96,49], index: 0, kind: input, shape index: {}]   ;;  %s608_s1 = inlined_call_operand.vmem [shape: f32[96,96], index: 1, kind: input, shape index: {}]   ;;  %s609_s2 = inlined_call_operand.vmem [shape: f32[96,1], index: 2, kind: input, shape index: {}]   ;;  %s610_s3 = inlined_call_operand.vmem [shape: f32[96,49], index: 3, kind: output, shape index: {}]  }
   0x1   :  { %v26_v0 = vld [vmem:[%s607_s0] sm:$0xff]  ;;  %v27_v1 = vld [vmem:[%s607_s0 + $0x8] sm:$0xff]  ;;  %v28_v2 = vld [vmem:[%s607_s0 + $0x10] sm:$0xff]  ;;  %417 = vset.pattern.permute.xlu1 %v418_v3  ;;  %416 = vset.pattern.permute.xlu0 %v418_v3 }
   0x2   :  { %v379_v4 = vpack.c.bf16 %v27_v1, %v26_v0  ;;  %v29_v5 = vld [vmem:[%s607_s0 + $0x18] sm:$0xff]  ;;  %v30_v7 = vld [vmem:[%s607_s0 + $0x20] sm:$0xff]  ;;  %v31_v8 = vld [vmem:[%s607_s0 + $0x28] sm:$0xff] }
   0x3   :  { %v383_v6 = vpack.c.bf16 %v29_v5, %v28_v2  ;;  %v14_v9 = vld [vmem:[%s608_s1] sm:$0xff]  ;;  %v20_v10 = vld [vmem:[%s608_s1 + $0x30] sm:$0xff]  ;;  %v387_v11 = vpack.c.bf16 %v31_v8, %v30_v7  ;;  %v33_v13 = vld [vmem:[%s607_s0 + $0x38] sm:$0xff] }
   0x4   :  { %380 = vmatprep.subr.bf16.mxu0 %v379_v4  ;;  %403 = vmatprep.subr.bf16.mxu1 %v379_v4  ;;  %v32_v12 = vld [vmem:[%s607_s0 + $0x30] sm:$0xff]  ;;  %v38_v15 = vld [vmem:[%s609_s2] sm:$0xff]  ;;  %v35_v18 = vld [vmem:[%s607_s0 + $0x48] sm:$0xff] }
   0x5   :  { %382 = vmatpush3.bf16.msra.mxu0 %v379_v4  ;;  %409 = vmatpush3.bf16.msra.mxu1 %v379_v4  ;;  %v40_v14 = vld [vmem:[%s609_s2 + $0x10] sm:$0xff]  ;;  %v391_v16 = vpack.c.bf16 %v33_v13, %v32_v12  ;;  %v34_v17 = vld [vmem:[%s607_s0 + $0x40] sm:$0xff]  ;;  %v41_v19 = vld [vmem:[%s609_s2 + $0x18] sm:$0xff] }
   0x6   :  { %384 = vmatprep.subr.bf16.mxu0 %v383_v6  ;;  %404 = vmatprep.subr.bf16.mxu1 %v383_v6  ;;  %v39_v20 = vld [vmem:[%s609_s2 + $0x8] sm:$0xff]  ;;  %v395_v21 = vpack.c.bf16 %v35_v18, %v34_v17  ;;  %v36_v22 = vld [vmem:[%s607_s0 + $0x50] sm:$0xff]  ;;  %v37_v23 = vld [vmem:[%s607_s0 + $0x58] sm:$0xff] }
   0x7   :  { %361 = vmatprep.mubr.msk.f32.mxu0 %vm110_vm0, %v14_v9  ;;  %370 = vmatprep.mubr.msk.f32.mxu1 %vm110_vm0, %v20_v10  ;;  %v43_v24 = vld [vmem:[%s609_s2 + $0x28] sm:$0xff]  ;;  %v42_v25 = vld [vmem:[%s609_s2 + $0x20] sm:$0xff]  ;;  %v399_v26 = vpack.c.bf16 %v37_v23, %v36_v22  ;;  %v45_v27 = vld [vmem:[%s609_s2 + $0x38] sm:$0xff] }
   0x8   :  { %62 = vperm.xlu1 %417, %v40_v14   ;;  %52 = vperm.xlu0 %416, %v38_v15   ;;  %v44_v28 = vld [vmem:[%s609_s2 + $0x30] sm:$0xff]  ;;  %v47_v29 = vld [vmem:[%s609_s2 + $0x48] sm:$0xff]  ;;  %v46_v30 = vld [vmem:[%s609_s2 + $0x40] sm:$0xff] }
   0x9   :  { %386 = vmatpush3.bf16.msra.mxu0 %v383_v6  ;;  %410 = vmatpush3.bf16.msra.mxu1 %v383_v6  ;;  %v15_v31 = vld [vmem:[%s608_s1 + $0x8] sm:$0xff]  ;;  %v21_v32 = vld [vmem:[%s608_s1 + $0x38] sm:$0xff]  ;;  %v16_v33 = vld [vmem:[%s608_s1 + $0x10] sm:$0xff] }
   0xa   :  { %388 = vmatprep.subr.bf16.mxu0 %v387_v11  ;;  %405 = vmatprep.subr.bf16.mxu1 %v387_v11  ;;  %v22_v34 = vld [vmem:[%s608_s1 + $0x40] sm:$0xff]  ;;  %v49_v35 = vld [vmem:[%s609_s2 + $0x58] sm:$0xff]  ;;  %v48_v36 = vld [vmem:[%s609_s2 + $0x50] sm:$0xff] }
   0xb   :  { %v17_v37 = vld [vmem:[%s608_s1 + $0x18] sm:$0xff]  ;;  %v23_v38 = vld [vmem:[%s608_s1 + $0x48] sm:$0xff]  ;;  %v18_v39 = vld [vmem:[%s608_s1 + $0x20] sm:$0xff] }
   0xc   :  { %67 = vperm.xlu1 %417, %v41_v19   ;;  %57 = vperm.xlu0 %416, %v39_v20   ;;  %v24_v40 = vld [vmem:[%s608_s1 + $0x50] sm:$0xff]  ;;  %v19_v41 = vld [vmem:[%s608_s1 + $0x28] sm:$0xff]  ;;  %v25_v42 = vld [vmem:[%s608_s1 + $0x58] sm:$0xff] }
   0xd   :  { %390 = vmatpush3.bf16.msra.mxu0 %v387_v11  ;;  %411 = vmatpush3.bf16.msra.mxu1 %v387_v11 }
   0xe   :  { %392 = vmatprep.subr.bf16.mxu0 %v391_v16  ;;  %406 = vmatprep.subr.bf16.mxu1 %v391_v16 }
  0x10   :  { %77 = vperm.xlu1 %417, %v43_v24   ;;  %72 = vperm.xlu0 %416, %v42_v25  }
  0x11   :  { %394 = vmatpush3.bf16.msra.mxu0 %v391_v16  ;;  %412 = vmatpush3.bf16.msra.mxu1 %v391_v16 }
  0x12   :  { %396 = vmatprep.subr.bf16.mxu0 %v395_v21  ;;  %407 = vmatprep.subr.bf16.mxu1 %v395_v21 }
  0x14   :  { %87 = vperm.xlu1 %417, %v45_v27   ;;  %82 = vperm.xlu0 %416, %v44_v28  }
  0x15   :  { %398 = vmatpush3.bf16.msra.mxu0 %v395_v21  ;;  %413 = vmatpush3.bf16.msra.mxu1 %v395_v21 }
  0x16   :  { %400 = vmatprep.subr.bf16.mxu0 %v399_v26  ;;  %408 = vmatprep.subr.bf16.mxu1 %v399_v26 }
  0x18   :  { %97 = vperm.xlu1 %417, %v47_v29   ;;  %92 = vperm.xlu0 %416, %v46_v30  }
  0x19   :  { %402 = vmatpush3.bf16.msra.mxu0 %v399_v26  ;;  %414 = vmatpush3.bf16.msra.mxu1 %v399_v26 }
  0x1c   :  { %362 = vmatmul.mubr.msk.f32.vlgmr.msra.gmra.mrb[0].mxu0 %vm110_vm0, %v15_v31  ;;  %371 = vmatmul.mubr.msk.f32.vlgmr.msra.gmra.mrb[0].mxu1 %vm110_vm0, %v21_v32 }
  0x1d   :  { %364 = vmatprep.mubr.msk.f32.mxu0 %vm110_vm0, %v16_v33  ;;  %373 = vmatprep.mubr.msk.f32.mxu1 %vm110_vm0, %v22_v34 }
  0x1e   :  { %107 = vperm.xlu1 %417, %v49_v35   ;;  %102 = vperm.xlu0 %416, %v48_v36  }
  0x20   :  { %365 = vmatmul.mubr.msk.f32.gmra.mrb[2].mxu0 %vm110_vm0, %v17_v37  ;;  %374 = vmatmul.mubr.msk.f32.gmra.mrb[2].mxu1 %vm110_vm0, %v23_v38 }
  0x21   :  { %367 = vmatprep.mubr.msk.f32.mxu0 %vm110_vm0, %v18_v39  ;;  %376 = vmatprep.mubr.msk.f32.mxu1 %vm110_vm0, %v24_v40 }
  0x24   :  { %368 = vmatmul.mubr.msk.f32.gmra.mrb[4].mxu0 %vm110_vm0, %v19_v41  ;;  %377 = vmatmul.mubr.msk.f32.gmra.mrb[4].mxu1 %vm110_vm0, %v25_v42 }
  0x87   :  { %v63_v43 = vpop.permute.xlu1 %62  ;;  %v53_v44 = vpop.permute.xlu0 %52 }
  0x8b   :  { %v68_v45 = vpop.permute.xlu1 %67  ;;  %v58_v46 = vpop.permute.xlu0 %57 }
  0x8f   :  { %v78_v47 = vpop.permute.xlu1 %77  ;;  %v73_v48 = vpop.permute.xlu0 %72 }
  0x93   :  { %v88_v49 = vpop.permute.xlu1 %87  ;;  %v83_v50 = vpop.permute.xlu0 %82 }
  0x97   :  { %v98_v51 = vpop.permute.xlu1 %97  ;;  %v93_v52 = vpop.permute.xlu0 %92 }
  0x9d   :  { %v108_v9 = vpop.permute.xlu1 %107  ;;  %v103_v10 = vpop.permute.xlu0 %102 }
  0xef   :  { %v363_v53 = vpop.f32.mrb[0].mxu0  ;;  %v372_v54 = vpop.f32.mrb[0].mxu1 }
  0xf0   :  { %v219_v55 = vadd.f32 %v363_v53, %v58_v46  ;;  %v249_v56 = vadd.f32 %v372_v54, %v88_v49  ;;  %v213_v57 = vpop.f32.mrb[1].mxu0  ;;  %v243_v58 = vpop.f32.mrb[1].mxu1 }
  0xf1   :  { %v214_v59 = vadd.f32 %v213_v57, %v53_v44  ;;  %v244_v60 = vadd.f32 %v243_v58, %v83_v50 }
  0xf2   :  { %v273_v61 = vmax.f32 %v219_v55, 0.0  ;;  %v279_v62 = vmax.f32 %v249_v56, 0.0 }
  0xf3   :  { %v272_v63 = vmax.f32 %v214_v59, 0.0  ;;  %v278_v0 = vmax.f32 %v244_v60, 0.0  ;;  %v366_v1 = vpop.f32.mrb[2].mxu0  ;;  %v375_v2 = vpop.f32.mrb[2].mxu1 }
  0xf4   :  { %286 = vst.msk [vmem:[%s610_s3 + $0x8] sm:$0xff] %vm284_vm1, %v273_v61  ;;  %292 = vst.msk [vmem:[%s610_s3 + $0x38] sm:$0xff] %vm284_vm1, %v279_v62  ;;  %v229_v3 = vadd.f32 %v366_v1, %v68_v45  ;;  %v259_v4 = vadd.f32 %v375_v2, %v98_v51  ;;  %v223_v5 = vpop.f32.mrb[3].mxu0  ;;  %v253_v6 = vpop.f32.mrb[3].mxu1 }
  0xf5   :  { %285 = vst.msk [vmem:[%s610_s3] sm:$0xff] %vm284_vm1, %v272_v63  ;;  %291 = vst.msk [vmem:[%s610_s3 + $0x30] sm:$0xff] %vm284_vm1, %v278_v0  ;;  %v224_v7 = vadd.f32 %v223_v5, %v63_v43  ;;  %v254_v8 = vadd.f32 %v253_v6, %v93_v52 }
  0xf6   :  { %v275_v11 = vmax.f32 %v229_v3, 0.0  ;;  %v281_v12 = vmax.f32 %v259_v4, 0.0 }
  0xf7   :  { %v274_v13 = vmax.f32 %v224_v7, 0.0  ;;  %v280_v14 = vmax.f32 %v254_v8, 0.0  ;;  %v369_v15 = vpop.f32.mrb[4].mxu0  ;;  %v378_v16 = vpop.f32.mrb[4].mxu1 }
  0xf8   :  { %288 = vst.msk [vmem:[%s610_s3 + $0x18] sm:$0xff] %vm284_vm1, %v275_v11  ;;  %294 = vst.msk [vmem:[%s610_s3 + $0x48] sm:$0xff] %vm284_vm1, %v281_v12  ;;  %v239_v17 = vadd.f32 %v369_v15, %v78_v47  ;;  %v269_v18 = vadd.f32 %v378_v16, %v108_v9  ;;  %v233_v19 = vpop.f32.mrb[5].mxu0  ;;  %v263_v20 = vpop.f32.mrb[5].mxu1 }
  0xf9   :  { %287 = vst.msk [vmem:[%s610_s3 + $0x10] sm:$0xff] %vm284_vm1, %v274_v13  ;;  %293 = vst.msk [vmem:[%s610_s3 + $0x40] sm:$0xff] %vm284_vm1, %v280_v14  ;;  %v234_v21 = vadd.f32 %v233_v19, %v73_v48  ;;  %v264_v22 = vadd.f32 %v263_v20, %v103_v10 }
  0xfa   :  { %v277_v23 = vmax.f32 %v239_v17, 0.0  ;;  %v283_v24 = vmax.f32 %v269_v18, 0.0 }
  0xfb   :  { %v276_v25 = vmax.f32 %v234_v21, 0.0  ;;  %v282_v26 = vmax.f32 %v264_v22, 0.0 }
  0xfc   :  { %290 = vst.msk [vmem:[%s610_s3 + $0x28] sm:$0xff] %vm284_vm1, %v277_v23  ;;  %296 = vst.msk [vmem:[%s610_s3 + $0x58] sm:$0xff] %vm284_vm1, %v283_v24 }
  0xfd   :  { %289 = vst.msk [vmem:[%s610_s3 + $0x20] sm:$0xff] %vm284_vm1, %v276_v25  ;;  %295 = vst.msk [vmem:[%s610_s3 + $0x50] sm:$0xff] %vm284_vm1, %v282_v26 }

</bundles_post_ra>
